<compile_context>
chip_gen: v7x
topology: tpu7x:2x2x1
jax: 0.10.0
libtpu: 0.0.40
codegen_flags: <defaults>
</compile_context>

<pallas_src>
import jax
import jax.numpy as jnp
from jax.experimental import pallas as pl
from jax.experimental.pallas import tpu as pltpu


def mlp_kernel(x_ref, p_ref, out_ref):
    # x_ref:   (1, Np)  f32, batch on lanes
    # p_ref:   (Hp, 3)  f32, packed params: col 0 = w1, col 1 = b1, col 2 = w2
    #                   (b2 is folded into two spare hidden rows of b1/w2)
    # out_ref: (1, Np)  f32, lane-dense output row
    p = p_ref[...]
    w1 = p[:, 0:1]                                            # (Hp, 1)
    b1 = p[:, 1:2]                                            # (Hp, 1)
    w2 = p[:, 2:3]                                            # (Hp, 1)
    h = jnp.maximum(w1 * x_ref[...] + b1, 0.0)                # (Hp, Np), VPU broadcast FMA
    out_ref[...] = jnp.sum(h * w2, axis=0, keepdims=True)     # (1, Np),  XLU sublane reduce


def pack_params(w1, b1, w2, b2):
    """One-time (model-load) packing of all Net parameters into a single VMEM operand.

    w1: (F, H) with F == 1; b1: (H,); w2: (H, O) with O == 1; b2: (O,).
    Returns (Hp, 3) f32 with Hp a multiple of 8 and Hp >= H + 2; the two extra
    rows carry the output bias via relu(b2) - relu(-b2) = b2."""
    F, H = w1.shape
    O = w2.shape[1]
    assert F == 1 and O == 1, "kernel is specialized for Net(n_features=1, ..., n_output=1)"
    Hp = ((H + 2 + 7) // 8) * 8          # sublane multiple, with >= 2 spare rows for b2
    b2s = b2.astype(jnp.float32)[0]

    params = jnp.zeros((Hp, 3), jnp.float32)
    params = params.at[:H, 0].set(w1[0, :].astype(jnp.float32))
    params = params.at[:H, 1].set(b1.astype(jnp.float32))
    params = params.at[:H, 2].set(w2[:, 0].astype(jnp.float32))
    # Fold b2: row H contributes relu(b2)*1, row H+1 contributes relu(-b2)*(-1).
    params = params.at[H, 1].set(b2s)
    params = params.at[H, 2].set(1.0)
    params = params.at[H + 1, 1].set(-b2s)
    params = params.at[H + 1, 2].set(-1.0)
    return params


@jax.jit
def net_forward(x, params):
    """x: (N, 1) f32; params: packed (Hp, 3) from pack_params(). Returns (N, 1) f32,
    matching PyTorch: predict(relu(hidden(x)))."""
    N = x.shape[0]
    Np = ((N + 127) // 128) * 128        # pad batch to full lane rows

    # Per-call work: pad x onto a lane row, one pallas_call, slice back to (N, 1).
    x_row = jnp.zeros((1, Np), jnp.float32).at[0, :N].set(x[:, 0].astype(jnp.float32))

    y_row = pl.pallas_call(
        mlp_kernel,
        out_shape=jax.ShapeDtypeStruct((1, Np), jnp.float32),
        in_specs=[
            pl.BlockSpec(memory_space=pltpu.MemorySpace.VMEM),   # x_row
            pl.BlockSpec(memory_space=pltpu.MemorySpace.VMEM),   # packed params
        ],
        out_specs=pl.BlockSpec(memory_space=pltpu.MemorySpace.VMEM),
        compiler_params=pltpu.CompilerParams(
            # Allow XLA to fuse the x-pad producer into the pallas_call input
            # instead of materializing the (1, Np) row in HBM first.
            allow_input_fusion=[True, False],
        ),
    )(x_row, params)

    # Un-pad and return the PyTorch (N, 1) layout (kept inside the jitted region).
    return y_row[0, :N].reshape(N, 1)


if __name__ == "__main__":
    # Shapes matching the tutorial: x = linspace(-1, 1, 50).unsqueeze(1),
    # Net(n_features=1, n_hidden=10, n_output=1)
    N, F, H, O = 50, 1, 10, 1

    key = jax.random.PRNGKey(0)
    k1, k2, k3, k4 = jax.random.split(key, 4)

    # Deterministic init (PyTorch Linear default is U(-1/sqrt(in), 1/sqrt(in)));
    # weights stored as (in, out) so the reference is a plain x @ W + b.
    bound1 = 1.0 / (F ** 0.5)
    bound2 = 1.0 / (H ** 0.5)
    w1 = jax.random.uniform(k1, (F, H), jnp.float32, -bound1, bound1)
    b1 = jax.random.uniform(k2, (H,), jnp.float32, -bound1, bound1)
    w2 = jax.random.uniform(k3, (H, O), jnp.float32, -bound2, bound2)
    b2 = jax.random.uniform(k4, (O,), jnp.float32, -bound2, bound2)

    x = jnp.linspace(-1.0, 1.0, N, dtype=jnp.float32).reshape(N, F)

    # Parameter packing/padding happens once, outside the per-call path.
    params = pack_params(w1, b1, w2, b2)

    out = jax.block_until_ready(net_forward(x, params))

    # Pure-JAX reference
    ref = jnp.maximum(x @ w1 + b1, 0.0) @ w2 + b2
    assert out.shape == (N, O)
    assert jnp.allclose(out, ref, atol=1e-5, rtol=1e-5)

    print("KERNEL_OK")
</pallas_src>

<mosaic_0001>
module attributes {stable_mosaic.version = 11 : i64} {
  func.func @mlp_kernel(%arg0: memref<1x128xf32, #tpu.memory_space<vmem>>, %arg1: memref<16x3xf32, #tpu.memory_space<vmem>>, %arg2: memref<1x128xf32, #tpu.memory_space<vmem>>) attributes {dimension_semantics = [], scalar_prefetch = 0 : i64, scratch_operands = 0 : i64, tpu.core_type = #tpu.core_type<tc>} {
    %c0 = arith.constant 0 : index
    %c0_0 = arith.constant 0 : index
    %0 = vector.load %arg1[%c0, %c0_0] : memref<16x3xf32, #tpu.memory_space<vmem>>, vector<16x3xf32>
    %1 = vector.extract_strided_slice %0 {offsets = [0, 0], sizes = [16, 1], strides = [1, 1]} : vector<16x3xf32> to vector<16x1xf32>
    %2 = vector.extract_strided_slice %0 {offsets = [0, 1], sizes = [16, 1], strides = [1, 1]} : vector<16x3xf32> to vector<16x1xf32>
    %3 = vector.extract_strided_slice %0 {offsets = [0, 2], sizes = [16, 1], strides = [1, 1]} : vector<16x3xf32> to vector<16x1xf32>
    %c0_1 = arith.constant 0 : index
    %c0_2 = arith.constant 0 : index
    %4 = vector.load %arg0[%c0_1, %c0_2] : memref<1x128xf32, #tpu.memory_space<vmem>>, vector<1x128xf32>
    %5 = vector.broadcast %1 : vector<16x1xf32> to vector<16x128xf32>
    %6 = vector.broadcast %4 : vector<1x128xf32> to vector<16x128xf32>
    %7 = arith.mulf %5, %6 : vector<16x128xf32>
    %8 = vector.broadcast %2 : vector<16x1xf32> to vector<16x128xf32>
    %9 = arith.addf %7, %8 : vector<16x128xf32>
    %cst = arith.constant 0.000000e+00 : f32
    %10 = vector.broadcast %cst : f32 to vector<16x128xf32>
    %11 = arith.maximumf %9, %10 : vector<16x128xf32>
    %12 = vector.broadcast %3 : vector<16x1xf32> to vector<16x128xf32>
    %13 = arith.mulf %11, %12 : vector<16x128xf32>
    %cst_3 = arith.constant dense<0.000000e+00> : vector<128xf32>
    %14 = vector.multi_reduction <add>, %13, %cst_3 [0] : vector<16x128xf32> to vector<128xf32>
    %15 = vector.shape_cast %14 : vector<128xf32> to vector<1x128xf32>
    %c0_4 = arith.constant 0 : index
    %c0_5 = arith.constant 0 : index
    %16 = vector.load %arg2[%c0_4, %c0_5] : memref<1x128xf32, #tpu.memory_space<vmem>>, vector<1x128xf32>
    tpu.vector_store %arg2[%c0_4, %c0_5], %15 {strides = array<i32>} : memref<1x128xf32, #tpu.memory_space<vmem>>, vector<1x128xf32>,
    return
  }
}

</mosaic_0001>

<bundles_post_ra>
// kernel: net_forward.2
= control target key start
LH: loop header
LB: loop body
LE: loop exit
PB: predicated region body
PF: predicated region fallthrough
CT: control target
= control target key end

     0   :  { %s127_s0 = inlined_call_operand.vmem [shape: f32[16,3], index: 0, kind: input, shape index: {}]   ;;  %s128_s1 = inlined_call_operand.vmem [shape: f32[1,50], index: 1, kind: input, shape index: {}]   ;;  %s129_s2 = inlined_call_operand.<no memory space> [shape: f32[], index: 2, kind: input, shape index: {}]   ;;  %s130_s3 = inlined_call_operand.vmem [shape: f32[1,128], index: 3, kind: output, shape index: {}]  }
   0x1   :  { %v8_v0 = vstv %s129_s2 }
   0x2   :  { %v26_v1 = vld [vmem:[%s127_s0] sm:$0xff]  ;;  %v14_v2 = vlaneseq  ;;  %v89_v3 = vmov 1   ;;  %v90_v4 = vmov 0   ;;  %v27_v8 = vld [vmem:[%s127_s0 + $0x8] sm:$0xff]  ;;  %v91_v11 = vmov 2  }
   0x3   :  { %86 = vset.pattern.permute.xlu1 %v89_v3  ;;  %85 = vset.pattern.permute.xlu0 %v90_v4  ;;  %v13_v5 = vld [vmem:[%s128_s1] sm:$0x1] }
   0x4   :  { %48 = vperm.xlu1 %86, %v26_v1   ;;  %31 = vperm.xlu0 %85, %v26_v1   ;;  %v15_v6 = vshrl.u32 %v14_v2, 7  ;;  %v20_v7 = vand.u32 127, %v14_v2 }
   0x6   :  { %vm17_vm0 = vcmp.lt.s32.totalorder %v15_v6, 1  ;;  %vm22_vm1 = vcmp.lt.s32.totalorder %v20_v7, 50 }
   0x7   :  { %v18_v9 = vsel %vm17_vm0, %v13_v5, %v8_v0 }
   0x8   :  { %52 = vperm.xlu1 %86, %v27_v8   ;;  %36 = vperm.xlu0 %85, %v27_v8   ;;  %v23_v10 = vsel %vm22_vm1, %v18_v9, %v8_v0 }
   0x9   :  { %25 = vst [vmem:[#allocation7] sm:$0x1] %v23_v10 }
   0xc   :  { %87 = vset.pattern.permute.xlu0 %v91_v11  ;;  %88 = vset.pattern.permute.xlu1 %v91_v11 }
   0xd   :  { %60 = vperm.xlu0 %87, %v26_v1   ;;  %64 = vperm.xlu1 %88, %v27_v8  }
  0x10   :  { %v81_v12 = vld [vmem:[#allocation7] ss:$0 sm:$0xff] }
  0x83   :  { %v49_v13 = vpop.permute.xlu1 %48  ;;  %v32_v14 = vpop.permute.xlu0 %31 }
  0x84   :  { %v45_v15 = vmul.f32 %v81_v12, %v32_v14 }
  0x86   :  { %v55_v16 = vadd.f32 %v49_v13, %v45_v15 }
  0x87   :  { %v37_v17 = vpop.permute.xlu0 %36  ;;  %v53_v18 = vpop.permute.xlu1 %52 }
  0x88   :  { %v46_v19 = vmul.f32 %v81_v12, %v37_v17  ;;  %v57_v21 = vmax.f32 %v55_v16, 0.0 }
  0x8a   :  { %v56_v20 = vadd.f32 %v53_v18, %v46_v19 }
  0x8c   :  { %v61_v22 = vpop.permute.xlu0 %60  ;;  %v65_v23 = vpop.permute.xlu1 %64  ;;  %v58_v24 = vmax.f32 %v56_v20, 0.0 }
  0x8d   :  { %v67_v25 = vmul.f32 %v61_v22, %v57_v21 }
  0x8e   :  { %v68_v26 = vmul.f32 %v65_v23, %v58_v24 }
  0x90   :  { %v69_v27 = vadd.f32 %v68_v26, %v67_v25 }
  0x92   :  { %v70_v28 = vrot.slane %v69_v27, 4 }
  0x94   :  { %v71_v29 = vadd.f32 %v70_v28, %v69_v27 }
  0x96   :  { %v72_v30 = vrot.slane %v71_v29, 2 }
  0x98   :  { %v73_v31 = vadd.f32 %v72_v30, %v71_v29 }
  0x9a   :  { %v74_v32 = vrot.slane %v73_v31, 1 }
  0x9c   :  { %v75_v33 = vadd.f32 %v74_v32, %v73_v31 }
  0x9e   :  { %76 = vst [vmem:[%s130_s3] sm:$0x1] %v75_v33 }

</bundles_post_ra>
